<compile_context>
chip_gen: v7x
topology: tpu7x:2x2x1
jax: 0.10.0
libtpu: 0.0.40
codegen_flags: <defaults>
</compile_context>

<pallas_src>
import functools

import jax
import jax.numpy as jnp
import numpy as np
from jax.experimental import pallas as pl
from jax.experimental.pallas import tpu as pltpu


def value_head_kernel(x_ref, w1_ref, b1_ref, w2_ref, wc_ref, bc_ref, b2_ref, o_ref):
    # x_ref : (TN, C, HW) f32  VMEM  activations (native dtype, batch-tiled)
    # w1_ref: (HW, 256)   bf16 VMEM  fc1 weight, pre-transposed, resident
    # b1_ref: (1, 256)    f32  VMEM  fc1 bias
    # w2_ref: (8, 256)    f32  VMEM  fc2 weight row replicated over 8 sublanes
    # wc_ref: (C,)        f32  SMEM  conv weight folded with BN scale
    # bc_ref: (1,)        f32  SMEM  folded conv+BN bias
    # b2_ref: (1,)        f32  SMEM  fc2 bias
    # o_ref : (1, TN)     f32  VMEM  lane-dense output row
    c = x_ref.shape[1]

    # 1x1 conv (C -> 1) + folded eval-mode BN: per-channel accumulation on the
    # VPU in f32.  Slicing the ref per channel avoids materializing a second
    # full (TN, C, HW) tile; at f32 HBM rates the ~2 VALU ops/element stay well
    # hidden under the x DMA on all generations.
    # TODO(synk): for very large production C a channel-minor layout from the
    #             upstream layer would let this contraction run on the MXU.
    acc = x_ref[:, 0, :] * wc_ref[0]
    for ch in range(1, c):                                  # static, small C
        acc = acc + x_ref[:, ch, :] * wc_ref[ch]
    h = jnp.maximum(acc + bc_ref[0], 0.0)                   # (TN, HW), ReLU

    # fc1: (TN, HW) @ (HW, 256) on the MXU (bf16 operands, f32 accumulate).
    h1 = jnp.dot(h.astype(w1_ref.dtype), w1_ref[...],
                 preferred_element_type=jnp.float32)
    h1 = jnp.maximum(h1 + b1_ref[...], 0.0)                 # (TN, 256)

    # fc2 (256 -> 1) computed directly in lane orientation:
    # (8, 256) x (TN, 256)^T -> (8, TN); row 0 is the result.  This keeps the
    # output store lane-dense (unmasked vst, dense writeback DMA).
    out8 = jax.lax.dot_general(
        w2_ref[...], h1,
        dimension_numbers=(((1,), (1,)), ((), ())),
        preferred_element_type=jnp.float32)
    o_ref[...] = jnp.tanh(out8[0:1, :] + b2_ref[0]).astype(o_ref.dtype)


def prepare_params(params, *, weight_dtype=jnp.bfloat16, eps=1e-5):
    """Fold eval-mode BN into the 1x1 conv and pre-transpose/replicate FC weights.

    Call once at parameter-prep time, not per forward call."""
    scale = params["bn_gamma"] / jnp.sqrt(params["bn_var"] + eps)      # scalar
    return {
        "wc": (params["conv_w"] * scale).reshape(-1).astype(jnp.float32),   # (C,)
        "bc": (params["bn_beta"] - params["bn_mean"] * scale)
              .reshape(1).astype(jnp.float32),                              # (1,)
        "w1t": params["fc1_w"].T.astype(weight_dtype),                      # (HW, 256)
        "b1": params["fc1_b"].reshape(1, 256).astype(jnp.float32),
        "w2x8": jnp.broadcast_to(params["fc2_w"].reshape(1, 256), (8, 256))
                .astype(jnp.float32),                                       # (8, 256)
        "b2": params["fc2_b"].reshape(1).astype(jnp.float32),               # (1,)
    }


def _round_up(x, m):
    return (x + m - 1) // m * m


def _vmem_limit_bytes():
    """Per-generation VMEM budget (physical: v4/v5e/v6e 128 MiB, v7x 64 MiB)."""
    try:
        kind = jax.devices()[0].device_kind.lower()
    except Exception:
        kind = ""
    if "v2" in kind or "v3" in kind:
        return 12 << 20
    if "v4" in kind or "v5" in kind or "v6" in kind:
        return 96 << 20
    return 48 << 20          # v7x (64 MiB physical) and unknown: stay conservative


def _choose_tile_n(n_rows, c, hw, vmem_limit):
    """Largest batch tile whose *real* VMEM footprint fits the budget.

    Accounts for the f32 x slab padded to (ceil(C/8)*8, ceil(HW/128)*128) x2
    double buffers, the f32 conv accumulator, the bf16 MXU copy of it, the f32
    fc1 activations, and the resident weights."""
    c_pad = _round_up(c, 8)
    hw_pad = _round_up(hw, 128)
    per_row = (2 * c_pad * hw_pad * 4      # double-buffered f32 x slab (padded)
               + hw_pad * 4                # f32 conv accumulator
               + hw_pad * 2                # bf16 copy fed to the MXU
               + 256 * 4)                  # f32 fc1 activations
    fixed = 2 * (hw_pad * 256 * 2 + 256 * 4 + 8 * 256 * 4) + (2 << 20)  # weights + slack
    budget = max(int(vmem_limit * 0.75) - fixed, per_row * 128)
    tile = 128
    for cand in (2048, 1024, 512, 256, 128):   # >=256 preferred: fills MXU M dim
        if cand * per_row <= budget:
            tile = cand
            break
    if tile >= n_rows:
        tile = n_rows                          # single full-batch tile
    # Guarantee >=2 grid steps when the batch is big enough so v7x's two
    # TensorCores both get work ("parallel" axis); an extra ~0.35us step is
    # free on 1-TC v5e/v6e.  Multi-tile sizes stay multiples of 128 so the
    # lane-dense (1, tile) output block remains legal.
    if n_rows >= 256 and pl.cdiv(n_rows, tile) < 2:
        tile = _round_up(pl.cdiv(n_rows, 2), 128)
    return tile, pl.cdiv(n_rows, tile)


@jax.jit
def value_head_forward(x_nchw, prepared):
    """x_nchw: (N, C, H, W) float32; prepared: output of prepare_params()."""
    N, C, H, W = x_nchw.shape
    HW = H * W
    # Free reshape (contiguous).  x is consumed in its native dtype: no extra
    # cast/pad passes over x in HBM (the kernel is HBM-bound on reading x).
    x3 = x_nchw.reshape(N, C, HW)
    n_rows = N
    if N < 8:                                  # pathological tiny batch only
        n_rows = 8
        x3 = jnp.pad(x3, ((0, n_rows - N), (0, 0), (0, 0)))

    vmem_limit = _vmem_limit_bytes()
    tile_n, steps = _choose_tile_n(n_rows, C, HW, vmem_limit)
    n_out = steps * tile_n                     # all output blocks are full blocks

    smem = pltpu.MemorySpace.SMEM
    out = pl.pallas_call(
        value_head_kernel,
        out_shape=jax.ShapeDtypeStruct((1, n_out), jnp.float32),
        grid=(steps,),
        in_specs=[
            # x: batch-tiled, double-buffered HBM->VMEM DMA overlapping compute.
            # (Optional knob: pipeline_mode=pl.Buffered(3) if profiling shows
            # exposed DMA latency at small tiles.)
            pl.BlockSpec((tile_n, C, HW), lambda i: (i, 0, 0)),
            pl.BlockSpec((HW, 256), lambda i: (0, 0)),   # fc1 weight: VMEM-resident
            pl.BlockSpec((1, 256), lambda i: (0, 0)),    # fc1 bias: resident
            pl.BlockSpec((8, 256), lambda i: (0, 0)),    # fc2 weight rows: resident
            pl.BlockSpec(memory_space=smem),             # folded conv+BN weight (C,)
            pl.BlockSpec(memory_space=smem),             # folded conv+BN bias
            pl.BlockSpec(memory_space=smem),             # fc2 bias
        ],
        # Lane-dense output: one (1, tile_n) row per grid step.
        out_specs=pl.BlockSpec((1, tile_n), lambda i: (0, i)),
        compiler_params=pltpu.CompilerParams(
            dimension_semantics=("parallel",),   # shard batch tiles across TCs (v7x)
            vmem_limit_bytes=vmem_limit,
        ),
    )(x3, prepared["w1t"], prepared["b1"], prepared["w2x8"],
      prepared["wc"], prepared["bc"], prepared["b2"])
    # Rows beyond N came from partial/garbage tail blocks; per-row outputs are
    # independent, so they are simply dropped here.
    return out[0, :N].reshape(N, 1)


def value_head_reference(x_nchw, params, eps=1e-5):
    """Pure-JAX reference mirroring the PyTorch forward (eval-mode BN)."""
    N = x_nchw.shape[0]
    v = jnp.einsum("nchw,c->nhw", x_nchw, params["conv_w"])            # 1x1 conv, no bias
    v = (v - params["bn_mean"]) / jnp.sqrt(params["bn_var"] + eps)
    v = v * params["bn_gamma"] + params["bn_beta"]
    v = jax.nn.relu(v).reshape(N, -1)
    h1 = jax.nn.relu(v @ params["fc1_w"].T + params["fc1_b"])
    return jnp.tanh(h1 @ params["fc2_w"].T + params["fc2_b"])


def init_params(key, num_channels, board_h, board_w):
    HW = board_h * board_w
    ks = jax.random.split(key, 6)
    return {
        # Conv2d(num_channels, 1, kernel_size=1, bias=False) -> weight (1, C, 1, 1) == (C,)
        "conv_w": 0.1 * jax.random.normal(ks[0], (num_channels,), jnp.float32),
        # BatchNorm2d(1) parameters + running stats
        "bn_gamma": jnp.float32(1.0) + 0.05 * jax.random.normal(ks[1], (), jnp.float32),
        "bn_beta": 0.05 * jax.random.normal(ks[2], (), jnp.float32),
        "bn_mean": jnp.float32(0.01),
        "bn_var": jnp.float32(1.0),
        # Linear(HW, 256)
        "fc1_w": 0.05 * jax.random.normal(ks[3], (256, HW), jnp.float32),
        "fc1_b": 0.05 * jax.random.normal(ks[4], (256,), jnp.float32),
        # Linear(256, 1)
        "fc2_w": 0.05 * jax.random.normal(ks[5], (1, 256), jnp.float32),
        "fc2_b": jnp.array([0.02], jnp.float32),
    }


if __name__ == "__main__":
    N, C, H, W = 2, 4, 16, 16
    key = jax.random.PRNGKey(0)
    kx, kp = jax.random.split(key)
    x = jax.random.normal(kx, (N, C, H, W), jnp.float32)
    params = init_params(kp, C, H, W)
    prepared = prepare_params(params)

    out = jax.block_until_ready(value_head_forward(x, prepared))

    ref = value_head_reference(x, params)
    assert out.shape == (N, 1)
    # bf16 fc1-weight path vs f32 reference -> loosened tolerance (deliberate
    # inference-precision choice; conv input stays f32).
    np.testing.assert_allclose(np.asarray(out), np.asarray(ref), rtol=2e-2, atol=2e-2)
    print("KERNEL_OK")
</pallas_src>

<mosaic_0001>
module attributes {stable_mosaic.version = 11 : i64} {
  func.func @value_head_kernel(%arg0: i32, %arg1: memref<8x4x256xf32, #tpu.memory_space<vmem>>, %arg2: memref<256x256xbf16, #tpu.memory_space<vmem>>, %arg3: memref<1x256xf32, #tpu.memory_space<vmem>>, %arg4: memref<8x256xf32, #tpu.memory_space<vmem>>, %arg5: memref<4xf32, #tpu.memory_space<smem>>, %arg6: memref<1xf32, #tpu.memory_space<smem>>, %arg7: memref<1xf32, #tpu.memory_space<smem>>, %arg8: memref<1x8xf32, #tpu.memory_space<vmem>>) attributes {dimension_semantics = [#tpu.dimension_semantics<parallel>], iteration_bounds = array<i64: 1>, scalar_prefetch = 0 : i64, scratch_operands = 0 : i64, tpu.core_type = #tpu.core_type<tc>, window_params = [{transform_indices = @transform_0, window_bounds = array<i64: 8, 4, 256>}, {pipeline_mode = #tpu.pipeline_mode<synchronous>, transform_indices = @transform_1, window_bounds = array<i64: 256, 256>}, {pipeline_mode = #tpu.pipeline_mode<synchronous>, transform_indices = @transform_2, window_bounds = array<i64: 1, 256>}, {pipeline_mode = #tpu.pipeline_mode<synchronous>, transform_indices = @transform_3, window_bounds = array<i64: 8, 256>}, {transform_indices = @transform_4, window_bounds = array<i64: 4>}, {transform_indices = @transform_5, window_bounds = array<i64: 1>}, {transform_indices = @transform_6, window_bounds = array<i64: 1>}, {transform_indices = @transform_7, window_bounds = array<i64: 1, 8>}]} {
    %c0 = arith.constant 0 : index
    %c0_0 = arith.constant 0 : index
    %c0_1 = arith.constant 0 : index
    %0 = vector.load %arg1[%c0, %c0_0, %c0_1] : memref<8x4x256xf32, #tpu.memory_space<vmem>>, vector<8x1x256xf32>
    %1 = vector.shape_cast %0 : vector<8x1x256xf32> to vector<8x256xf32>
    %c0_2 = arith.constant 0 : index
    %2 = memref.load %arg5[%c0_2] : memref<4xf32, #tpu.memory_space<smem>>
    %3 = vector.broadcast %2 : f32 to vector<8x256xf32>
    %4 = arith.mulf %1, %3 : vector<8x256xf32>
    %c0_3 = arith.constant 0 : index
    %c1 = arith.constant 1 : index
    %c0_4 = arith.constant 0 : index
    %5 = vector.load %arg1[%c0_3, %c1, %c0_4] : memref<8x4x256xf32, #tpu.memory_space<vmem>>, vector<8x1x256xf32>
    %6 = vector.shape_cast %5 : vector<8x1x256xf32> to vector<8x256xf32>
    %c1_5 = arith.constant 1 : index
    %7 = memref.load %arg5[%c1_5] : memref<4xf32, #tpu.memory_space<smem>>
    %8 = vector.broadcast %7 : f32 to vector<8x256xf32>
    %9 = arith.mulf %6, %8 : vector<8x256xf32>
    %10 = arith.addf %4, %9 : vector<8x256xf32>
    %c0_6 = arith.constant 0 : index
    %c2 = arith.constant 2 : index
    %c0_7 = arith.constant 0 : index
    %11 = vector.load %arg1[%c0_6, %c2, %c0_7] : memref<8x4x256xf32, #tpu.memory_space<vmem>>, vector<8x1x256xf32>
    %12 = vector.shape_cast %11 : vector<8x1x256xf32> to vector<8x256xf32>
    %c2_8 = arith.constant 2 : index
    %13 = memref.load %arg5[%c2_8] : memref<4xf32, #tpu.memory_space<smem>>
    %14 = vector.broadcast %13 : f32 to vector<8x256xf32>
    %15 = arith.mulf %12, %14 : vector<8x256xf32>
    %16 = arith.addf %10, %15 : vector<8x256xf32>
    %c0_9 = arith.constant 0 : index
    %c3 = arith.constant 3 : index
    %c0_10 = arith.constant 0 : index
    %17 = vector.load %arg1[%c0_9, %c3, %c0_10] : memref<8x4x256xf32, #tpu.memory_space<vmem>>, vector<8x1x256xf32>
    %18 = vector.shape_cast %17 : vector<8x1x256xf32> to vector<8x256xf32>
    %c3_11 = arith.constant 3 : index
    %19 = memref.load %arg5[%c3_11] : memref<4xf32, #tpu.memory_space<smem>>
    %20 = vector.broadcast %19 : f32 to vector<8x256xf32>
    %21 = arith.mulf %18, %20 : vector<8x256xf32>
    %22 = arith.addf %16, %21 : vector<8x256xf32>
    %c0_12 = arith.constant 0 : index
    %23 = memref.load %arg6[%c0_12] : memref<1xf32, #tpu.memory_space<smem>>
    %24 = vector.broadcast %23 : f32 to vector<8x256xf32>
    %25 = arith.addf %22, %24 : vector<8x256xf32>
    %cst = arith.constant 0.000000e+00 : f32
    %26 = vector.broadcast %cst : f32 to vector<8x256xf32>
    %27 = arith.maximumf %25, %26 : vector<8x256xf32>
    %28 = arith.truncf %27 : vector<8x256xf32> to vector<8x256xbf16>
    %c0_13 = arith.constant 0 : index
    %c0_14 = arith.constant 0 : index
    %29 = vector.load %arg2[%c0_13, %c0_14] : memref<256x256xbf16, #tpu.memory_space<vmem>>, vector<256x256xbf16>
    %cst_15 = arith.constant dense<0.000000e+00> : vector<8x256xf32>
    %30 = tpu.matmul %28, %29, %cst_15 {dimension_numbers = #tpu.dot_dimension_numbers<[1], [0], [0], [1], [0, 0, 1, 1], [], []>} : vector<8x256xbf16>, vector<256x256xbf16>, vector<8x256xf32> -> vector<8x256xf32>
    %c0_16 = arith.constant 0 : index
    %c0_17 = arith.constant 0 : index
    %31 = vector.load %arg3[%c0_16, %c0_17] : memref<1x256xf32, #tpu.memory_space<vmem>>, vector<1x256xf32>
    %32 = vector.broadcast %31 : vector<1x256xf32> to vector<8x256xf32>
    %33 = arith.addf %30, %32 : vector<8x256xf32>
    %cst_18 = arith.constant 0.000000e+00 : f32
    %34 = vector.broadcast %cst_18 : f32 to vector<8x256xf32>
    %35 = arith.maximumf %33, %34 : vector<8x256xf32>
    %c0_19 = arith.constant 0 : index
    %c0_20 = arith.constant 0 : index
    %36 = vector.load %arg4[%c0_19, %c0_20] : memref<8x256xf32, #tpu.memory_space<vmem>>, vector<8x256xf32>
    %cst_21 = arith.constant dense<0.000000e+00> : vector<8x8xf32>
    %37 = tpu.matmul %36, %35, %cst_21 {dimension_numbers = #tpu.dot_dimension_numbers<[1], [1], [0], [0], [0, 0, 1, 0], [], []>} : vector<8x256xf32>, vector<8x256xf32>, vector<8x8xf32> -> vector<8x8xf32>
    %38 = vector.extract_strided_slice %37 {offsets = [0, 0], sizes = [1, 8], strides = [1, 1]} : vector<8x8xf32> to vector<1x8xf32>
    %c0_22 = arith.constant 0 : index
    %39 = memref.load %arg7[%c0_22] : memref<1xf32, #tpu.memory_space<smem>>
    %40 = vector.broadcast %39 : f32 to vector<1x8xf32>
    %41 = arith.addf %38, %40 : vector<1x8xf32>
    %42 = math.tanh %41 : vector<1x8xf32>
    %c0_23 = arith.constant 0 : index
    %c0_24 = arith.constant 0 : index
    %43 = vector.load %arg8[%c0_23, %c0_24] : memref<1x8xf32, #tpu.memory_space<vmem>>, vector<1x8xf32>
    tpu.vector_store %arg8[%c0_23, %c0_24], %42 {strides = array<i32>} : memref<1x8xf32, #tpu.memory_space<vmem>>, vector<1x8xf32>,
    return
  }
  func.func @transform_0(%arg0: i32) -> (i32, i32, i32) {
    %c0_i32 = arith.constant 0 : i32
    %c0_i32_0 = arith.constant 0 : i32
    %c0_i32_1 = arith.constant 0 : i32
    return %arg0, %c0_i32, %c0_i32_0 : i32, i32, i32
  }
  func.func @transform_1(%arg0: i32) -> (i32, i32) {
    %c0_i32 = arith.constant 0 : i32
    %c0_i32_0 = arith.constant 0 : i32
    %c0_i32_1 = arith.constant 0 : i32
    return %c0_i32, %c0_i32_0 : i32, i32
  }
  func.func @transform_2(%arg0: i32) -> (i32, i32) {
    %c0_i32 = arith.constant 0 : i32
    %c0_i32_0 = arith.constant 0 : i32
    %c0_i32_1 = arith.constant 0 : i32
    return %c0_i32, %c0_i32_0 : i32, i32
  }
  func.func @transform_3(%arg0: i32) -> (i32, i32) {
    %c0_i32 = arith.constant 0 : i32
    %c0_i32_0 = arith.constant 0 : i32
    %c0_i32_1 = arith.constant 0 : i32
    return %c0_i32, %c0_i32_0 : i32, i32
  }
  func.func @transform_4(%arg0: i32) -> i32 {
    %c0_i32 = arith.constant 0 : i32
    %c0_i32_0 = arith.constant 0 : i32
    return %c0_i32 : i32
  }
  func.func @transform_5(%arg0: i32) -> i32 {
    %c0_i32 = arith.constant 0 : i32
    %c0_i32_0 = arith.constant 0 : i32
    return %c0_i32 : i32
  }
  func.func @transform_6(%arg0: i32) -> i32 {
    %c0_i32 = arith.constant 0 : i32
    %c0_i32_0 = arith.constant 0 : i32
    return %c0_i32 : i32
  }
  func.func @transform_7(%arg0: i32) -> (i32, i32) {
    %c0_i32 = arith.constant 0 : i32
    %c0_i32_0 = arith.constant 0 : i32
    return %c0_i32, %arg0 : i32, i32
  }
}

</mosaic_0001>

<bundles_post_ra>
// kernel: value_head_forward.1
= control target key start
LH: loop header
LB: loop body
LE: loop exit
PB: predicated region body
PF: predicated region fallthrough
CT: control target
= control target key end

     0   :  { %14 = vsyncpa [#allocation5], 0  ;;  %s1117_s0 = inlined_call_operand.vmem [shape: f32[8,4,256], index: 0, kind: input, shape index: {}]   ;;  %s1118_s1 = inlined_call_operand.hbm [shape: bf16[256,256], index: 1, kind: input, shape index: {}]   ;;  %s1119_s2 = inlined_call_operand.vmem [shape: f32[1,256], index: 2, kind: input, shape index: {}]   ;;  %s1120_s3 = inlined_call_operand.vmem [shape: f32[8,256], index: 3, kind: input, shape index: {}]   ;;  %s1121_s4 = inlined_call_operand.vmem [shape: f32[4], index: 4, kind: input, shape index: {}]   ;;  %s1122_s5 = inlined_call_operand.<no memory space> [shape: f32[1], index: 5, kind: input, shape index: {}]   ;;  %s1123_s6 = inlined_call_operand.<no memory space> [shape: f32[1], index: 6, kind: input, shape index: {}]   ;;  %s1124_s7 = inlined_call_operand.vmem [shape: f32[1,8], index: 7, kind: output, shape index: {}]  }
   0x1   :  { %15 = vsyncpa [#allocation6], 0  ;;  %s864_s24 = smov [#allocation4]   ;;  %s40_s28 = sshll.u32 %s1121_s4, 4  ;;  %s41_s28 = int_to_ptr.vmem [resolvable:$true] %s40_s28 }
   0x2   :  { %s23_s25 = sshll.u32 %s864_s24, 4  ;;  %s826_s8 = scalar_lea.hbm %s1118_s1, 4096  ;;  %s24_s25 = int_to_ptr.vmem [resolvable:$true] %s23_s25 }
   0x3   :  { %p827_p0 = scmp.ne.s32.totalorder %s1118_s1, %s826_s8  ;;  %p830_p1 = scmp.lt.u32.totalorder %s826_s8, %s1118_s1 }
   0x5   :  { %p832_p2 = pnand %p830_p1, %p827_p0 }
   0x7   :  { %835 = shalt.err (!%p832_p2)
}
   0x8   :  { %s836_s13 = scalar_lea.vmem %s24_s25, 4096  ;;  %p841_p4 = scmp.lt.s32.totalorder %s24_s25, %s24_s25 }
   0x9   :  { %p837_p3 = scmp.ne.s32.totalorder %s24_s25, %s836_s13  ;;  %p842_p5 = scmp.lt.s32.totalorder %s836_s13, %s836_s13 }
   0xb   :  { %p843_p6 = por %p842_p5, %p841_p4 }
   0xd   :  { %p844_p7 = pnand %p843_p6, %p837_p3 }
   0xf   :  { %847 = shalt.err (!%p844_p7)
}
  0x10   :  { %s865_s4 = smov 128   ;;  %s866_s14 = smov 8  }
  0x11   :  { %29 = dma.hbm_to_vmem [thread:$0]  %s1118_s1, 4096, %s24_s25, [#allocation5], %s865_s4, %s865_s4, %s866_s14  }
  0x12   :  { %s848_s17 = scalar_lea.vmem %s41_s28, 16  ;;  %p853_p9 = scmp.lt.s32.totalorder %s41_s28, %s41_s28 }
  0x13   :  { %p849_p8 = scmp.ne.s32.totalorder %s41_s28, %s848_s17  ;;  %p854_p10 = scmp.lt.s32.totalorder %s848_s17, %s848_s17 }
  0x15   :  { %p855_p11 = por %p854_p10, %p853_p9 }
  0x17   :  { %p856_p12 = pnand %p855_p11, %p849_p8 }
  0x19   :  { %859 = shalt.err (!%p856_p12)
}
  0x1a   :  { %s867_s18 = smov [#allocation7]  }
  0x1b   :  { %43 = dma.vmem_to_smem %s41_s28, 16, %s867_s18, [#allocation6]  }
  0x1c   :  { %860 = dma.done.wait [#allocation5], 4096  }
  0x1d   :  { %861 = vsyncadd [#allocation5], 4294963200 }
  0x1e   :  { %862 = dma.done.wait [#allocation6], 16  }
  0x1f   :  { %863 = vsyncadd [#allocation6], 4294967280 }
  0x20   :  { %54 = sfence }
  0x21   :  { %v776_v0 = vld [vmem:[#allocation4 + $0x4] ss:$8 sps:$4 sm:$0xff]   ;;  %v778_v1 = vld [vmem:[#allocation4] ss:$8 sps:$4 sm:$0xff]   ;;  %v779_v2 = vld [vmem:[#allocation4 + $0x14] ss:$8 sps:$4 sm:$0xff]   ;;  %v208_v9 = vlaneseq  ;;  %v959_v35 = vstv %s1122_s5 }
  0x22   :  { %579 = vmatprep.subr.bf16.mxu0 %v776_v0  ;;  %v781_v3 = vld [vmem:[#allocation4 + $0x10] ss:$8 sps:$4 sm:$0xff]   ;;  %v782_v4 = vld [vmem:[#allocation4 + $0x24] ss:$8 sps:$4 sm:$0xff]   ;;  %v784_v5 = vld [vmem:[#allocation4 + $0x20] ss:$8 sps:$4 sm:$0xff]  }
  0x23   :  { %580 = vmatpush1.bf16.msra.mxu0 %v778_v1  ;;  %v785_v6 = vld [vmem:[#allocation4 + $0x34] ss:$8 sps:$4 sm:$0xff]   ;;  %v787_v7 = vld [vmem:[#allocation4 + $0x30] ss:$8 sps:$4 sm:$0xff]   ;;  %v788_v8 = vld [vmem:[#allocation4 + $0x44] ss:$8 sps:$4 sm:$0xff]  }
  0x24   :  { %581 = vmatprep.subr.bf16.mxu0 %v779_v2  ;;  %s70_s1 = sld [smem:[#allocation7]]  ;;  %v790_v10 = vld [vmem:[#allocation4 + $0x40] ss:$8 sps:$4 sm:$0xff]   ;;  %s721_s19 = sld [smem:[#allocation7 + $0x1]]  ;;  %v791_v11 = vld [vmem:[#allocation4 + $0x54] ss:$8 sps:$4 sm:$0xff]  }
  0x25   :  { %v209_v12 = vshrl.u32 %v208_v9, 7  ;;  %s730_s20 = sld [smem:[#allocation7 + $0x2]]  ;;  %s923_s21 = sld [smem:[#allocation7 + $0x3]]  ;;  %v793_v13 = vld [vmem:[#allocation4 + $0x50] ss:$8 sps:$4 sm:$0xff]   ;;  %vm381_vm0 = vcmask 1041409  }
  0x26   :  { %v794_v14 = vld [vmem:[#allocation4 + $0x64] ss:$8 sps:$4 sm:$0xff]   ;;  %v796_v16 = vld [vmem:[#allocation4 + $0x60] ss:$8 sps:$4 sm:$0xff]   ;;  %v797_v19 = vld [vmem:[#allocation4 + $0x74] ss:$8 sps:$4 sm:$0xff]  }
  0x27   :  { %582 = vmatpush1.bf16.msra.mxu0 %v781_v3  ;;  %v925_v15 = vsub.s32 1, %v209_v12  ;;  %v55_v17 = vld [vmem:[%s1117_s0] ss:$4 sm:$0x3]  ;;  %v930_v18 = vsub.s32 0, %v209_v12  ;;  %vm384_vm1 = vcmask 1042434  }
  0x28   :  { %583 = vmatprep.subr.bf16.mxu0 %v782_v4  ;;  %v706_v20 = vld [vmem:[%s1117_s0 + $0x8] ss:$4 sm:$0x3]  ;;  %v707_v21 = vld [vmem:[%s1117_s0 + $0x10] ss:$4 sm:$0x3] }
  0x29   :  { %v708_v23 = vld [vmem:[%s1117_s0 + $0x18] ss:$4 sm:$0x3]  ;;  %v709_v24 = vld [vmem:[%s1117_s0 + $0x20] ss:$4 sm:$0x3] }
  0x2a   :  { %v71_v22 = vstv %s70_s1  ;;  %v710_v25 = vld [vmem:[%s1117_s0 + $0x28] ss:$4 sm:$0x3]  ;;  %v711_v26 = vld [vmem:[%s1117_s0 + $0x30] ss:$4 sm:$0x3]  ;;  %v97_v28 = vstv %s721_s19 }
  0x2b   :  { %584 = vmatpush1.bf16.msra.mxu0 %v784_v5  ;;  %v72_v27 = vmul.f32 %v71_v22, %v55_v17  ;;  %v799_v29 = vld [vmem:[#allocation4 + $0x70] ss:$8 sps:$4 sm:$0xff]   ;;  %v73_v31 = vmul.f32 %v706_v20, %v71_v22  ;;  %v74_v32 = vmul.f32 %v707_v21, %v71_v22  ;;  %v713_v33 = vld [vmem:[%s1117_s0 + $0x1] ss:$4 sm:$0x3]  ;;  %v131_v34 = vstv %s730_s20 }
  0x2c   :  { %585 = vmatprep.subr.bf16.mxu0 %v785_v6  ;;  %v712_v30 = vld [vmem:[%s1117_s0 + $0x38] ss:$4 sm:$0x3]  ;;  %v800_v36 = vld [vmem:[#allocation4 + $0x84] ss:$8 sps:$4 sm:$0xff]   ;;  %v75_v37 = vmul.f32 %v708_v23, %v71_v22  ;;  %v76_v38 = vmul.f32 %v709_v24, %v71_v22  ;;  %v98_v41 = vmul.f32 %v713_v33, %v97_v28  ;;  %v968_v42 = vstv %s923_s21 }
  0x2d   :  { %v714_v39 = vld [vmem:[%s1117_s0 + $0x9] ss:$4 sm:$0x3]  ;;  %v715_v40 = vld [vmem:[%s1117_s0 + $0x11] ss:$4 sm:$0x3]  ;;  %v77_v43 = vmul.f32 %v710_v25, %v71_v22  ;;  %v78_v44 = vmul.f32 %v711_v26, %v71_v22  ;;  %v79_v49 = vmul.f32 %v712_v30, %v71_v22 }
  0x2e   :  { %v716_v45 = vld [vmem:[%s1117_s0 + $0x19] ss:$4 sm:$0x3]  ;;  %v717_v46 = vld [vmem:[%s1117_s0 + $0x21] ss:$4 sm:$0x3]  ;;  %v99_v47 = vmul.f32 %v714_v39, %v97_v28  ;;  %v100_v48 = vmul.f32 %v715_v40, %v97_v28  ;;  %v106_v54 = vadd.f32 %v98_v41, %v72_v27 }
  0x2f   :  { %586 = vmatpush1.bf16.msra.mxu0 %v787_v7  ;;  %v718_v50 = vld [vmem:[%s1117_s0 + $0x29] ss:$4 sm:$0x3]  ;;  %v719_v51 = vld [vmem:[%s1117_s0 + $0x31] ss:$4 sm:$0x3]  ;;  %v101_v52 = vmul.f32 %v716_v45, %v97_v28  ;;  %v102_v53 = vmul.f32 %v717_v46, %v97_v28 }
  0x30   :  { %587 = vmatprep.subr.bf16.mxu0 %v788_v8  ;;  %v802_v55 = vld [vmem:[#allocation4 + $0x80] ss:$8 sps:$4 sm:$0xff]   ;;  %v720_v56 = vld [vmem:[%s1117_s0 + $0x39] ss:$4 sm:$0x3]  ;;  %v103_v57 = vmul.f32 %v718_v50, %v97_v28  ;;  %v104_v58 = vmul.f32 %v719_v51, %v97_v28  ;;  %v107_v59 = vadd.f32 %v99_v47, %v73_v31  ;;  %v108_v60 = vadd.f32 %v100_v48, %v74_v32 }
  0x31   :  { %v722_v61 = vld [vmem:[%s1117_s0 + $0x2] ss:$4 sm:$0x3]  ;;  %v803_v62 = vld [vmem:[#allocation4 + $0x94] ss:$8 sps:$4 sm:$0xff]   ;;  %v105_v63 = vmul.f32 %v720_v56, %v97_v28  ;;  %v109_v0 = vadd.f32 %v101_v52, %v75_v37  ;;  %v110_v1 = vadd.f32 %v102_v53, %v76_v38  ;;  %vm387_vm2 = vcmask 1043459  }
  0x32   :  { %v723_v2 = vld [vmem:[%s1117_s0 + $0xa] ss:$4 sm:$0x3]  ;;  %v724_v3 = vld [vmem:[%s1117_s0 + $0x12] ss:$4 sm:$0x3]  ;;  %v132_v4 = vmul.f32 %v722_v61, %v131_v34  ;;  %v111_v5 = vadd.f32 %v103_v57, %v77_v43  ;;  %v112_v6 = vadd.f32 %v104_v58, %v78_v44 }
  0x33   :  { %588 = vmatpush1.bf16.msra.mxu0 %v790_v10  ;;  %v725_v7 = vld [vmem:[%s1117_s0 + $0x1a] ss:$4 sm:$0x3]  ;;  %v726_v8 = vld [vmem:[%s1117_s0 + $0x22] ss:$4 sm:$0x3]  ;;  %v133_v9 = vmul.f32 %v723_v2, %v131_v34  ;;  %v134_v10 = vmul.f32 %v724_v3, %v131_v34 }
  0x34   :  { %589 = vmatprep.subr.bf16.mxu0 %v791_v11  ;;  %v113_v11 = vadd.f32 %v105_v63, %v79_v49  ;;  %v727_v12 = vld [vmem:[%s1117_s0 + $0x2a] ss:$4 sm:$0x3]  ;;  %v140_v17 = vadd.f32 %v132_v4, %v106_v54  ;;  %v729_v20 = vld [vmem:[%s1117_s0 + $0x3a] ss:$4 sm:$0x3] }
  0x35   :  { %v137_v21 = vmul.f32 %v727_v12, %v131_v34  ;;  %v141_v23 = vadd.f32 %v133_v9, %v107_v59  ;;  %v142_v24 = vadd.f32 %v134_v10, %v108_v60  ;;  %v731_v25 = vld [vmem:[%s1117_s0 + $0x3] ss:$4 sm:$0x3]  ;;  %v139_v27 = vmul.f32 %v729_v20, %v131_v34  ;;  %v732_v30 = vld [vmem:[%s1117_s0 + $0xb] ss:$4 sm:$0x3] }
  0x36   :  { %v806_v26 = vld [vmem:[#allocation4 + $0xa4] ss:$8 sps:$4 sm:$0xff]   ;;  %v733_v31 = vld [vmem:[%s1117_s0 + $0x13] ss:$4 sm:$0x3]  ;;  %v166_v32 = vmul.f32 %v731_v25, %v968_v42  ;;  %v167_v38 = vmul.f32 %v732_v30, %v968_v42  ;;  %vm390_vm3 = vcmask 1044484  }
  0x37   :  { %590 = vmatpush1.bf16.msra.mxu0 %v793_v13  ;;  %v728_v13 = vld [vmem:[%s1117_s0 + $0x32] ss:$4 sm:$0x3]  ;;  %v145_v33 = vadd.f32 %v137_v21, %v111_v5  ;;  %v734_v37 = vld [vmem:[%s1117_s0 + $0x1b] ss:$4 sm:$0x3]  ;;  %v168_v39 = vmul.f32 %v733_v31, %v968_v42  ;;  %v147_v40 = vadd.f32 %v139_v27, %v113_v11 }
  0x38   :  { %591 = vmatprep.subr.bf16.mxu0 %v794_v14  ;;  %v135_v14 = vmul.f32 %v725_v7, %v131_v34  ;;  %v138_v22 = vmul.f32 %v728_v13, %v131_v34  ;;  %v736_v41 = vld [vmem:[%s1117_s0 + $0x2b] ss:$4 sm:$0x3]  ;;  %v737_v43 = vld [vmem:[%s1117_s0 + $0x33] ss:$4 sm:$0x3]  ;;  %v169_v44 = vmul.f32 %v734_v37, %v968_v42  ;;  %v174_v46 = vadd.f32 %v166_v32, %v140_v17 }
  0x39   :  { %v738_v47 = vld [vmem:[%s1117_s0 + $0x3b] ss:$4 sm:$0x3]  ;;  %v171_v48 = vmul.f32 %v736_v41, %v968_v42  ;;  %v172_v49 = vmul.f32 %v737_v43, %v968_v42  ;;  %v175_v50 = vadd.f32 %v167_v38, %v141_v23  ;;  %v176_v51 = vadd.f32 %v168_v39, %v142_v24  ;;  %v808_v56 = vld [vmem:[#allocation4 + $0xa0] ss:$8 sps:$4 sm:$0xff]  }
  0x3a   :  { %v143_v28 = vadd.f32 %v135_v14, %v109_v0  ;;  %v173_v52 = vmul.f32 %v738_v47, %v968_v42  ;;  %v809_v61 = vld [vmem:[#allocation4 + $0xb4] ss:$8 sps:$4 sm:$0xff]   ;;  %v811_v9 = vld [vmem:[#allocation4 + $0xb0] ss:$8 sps:$4 sm:$0xff]   ;;  %vm393_vm4 = vcmask 1045509   ;;  %vm396_vm5 = vcmask 1046534  }
  0x3b   :  { %592 = vmatpush1.bf16.msra.mxu0 %v796_v16  ;;  %v136_v16 = vmul.f32 %v726_v8, %v131_v34  ;;  %v735_v34 = vld [vmem:[%s1117_s0 + $0x23] ss:$4 sm:$0x3]  ;;  %v179_v57 = vadd.f32 %v171_v48, %v145_v33  ;;  %v1043_v59 = vadd.f32 %v959_v35, %v175_v50  ;;  %v1046_v60 = vadd.f32 %v959_v35, %v176_v51  ;;  %v815_v33 = vld [vmem:[#allocation4 + $0xd4] ss:$8 sps:$4 sm:$0xff]  }
  0x3c   :  { %593 = vmatprep.subr.bf16.mxu0 %v797_v19  ;;  %v805_v19 = vld [vmem:[#allocation4 + $0x90] ss:$8 sps:$4 sm:$0xff]   ;;  %v170_v45 = vmul.f32 %v735_v34, %v968_v42  ;;  %v177_v53 = vadd.f32 %v169_v44, %v143_v28  ;;  %vm399_vm6 = vcmask 1047559   ;;  %v814_v28 = vld [vmem:[#allocation4 + $0xc0] ss:$8 sps:$4 sm:$0xff]   ;;  %vm698_vm7 = vcmask 57344  }
  0x3d   :  { %v193_v3 = vmax.f32 %v1043_v59, 0.0  ;;  %v194_v4 = vmax.f32 %v1046_v60, 0.0  ;;  %v817_v48 = vld [vmem:[#allocation4 + $0xd0] ss:$8 sps:$4 sm:$0xff]  }
  0x3e   :  { %v1049_v63 = vadd.f32 %v959_v35, %v177_v53  ;;  %v818_v53 = vld [vmem:[#allocation4 + $0xe4] ss:$8 sps:$4 sm:$0xff]  }
  0x3f   :  { %594 = vmatpush1.bf16.msra.mxu0 %v799_v29  ;;  %v144_v29 = vadd.f32 %v136_v16, %v110_v1  ;;  %v1055_v1 = vadd.f32 %v959_v35, %v179_v57  ;;  %v223_v12 = vrot.slane %v193_v3, %v925_v15  ;;  %v231_v13 = vrot.slane %v194_v4, %v925_v15 }
  0x40   :  { %595 = vmatprep.subr.bf16.mxu0 %v800_v36  ;;  %v146_v36 = vadd.f32 %v138_v22, %v112_v6  ;;  %v195_v6 = vmax.f32 %v1049_v63, 0.0  ;;  %v219_v47 = vrot.slane %v193_v3, %v930_v18 }
  0x41   :  { %v178_v54 = vadd.f32 %v170_v45, %v144_v29  ;;  %v197_v10 = vmax.f32 %v1055_v1, 0.0  ;;  %v291_v22 = vpack.c.bf16 %v223_v12, %v223_v12  ;;  %v293_v23 = vpack.c.bf16 %v231_v13, %v231_v13  ;;  %v820_v1 = vld [vmem:[#allocation4 + $0xe0] ss:$8 sps:$4 sm:$0xff]  }
  0x42   :  { %v180_v58 = vadd.f32 %v172_v49, %v146_v36  ;;  %v239_v16 = vrot.slane %v195_v6, %v925_v15 }
  0x43   :  { %596 = vmatpush1.bf16.msra.mxu0 %v802_v55  ;;  %v184_v55 = vadd.f32 %v959_v35, %v174_v46  ;;  %v1052_v42 = vadd.f32 %v959_v35, %v178_v54  ;;  %v255_v20 = vrot.slane %v197_v10, %v925_v15  ;;  %v367_v31 = vunpack.c.l.b16 %v291_v22 }
  0x44   :  { %597 = vmatprep.subr.bf16.mxu0 %v803_v62  ;;  %v181_v62 = vadd.f32 %v173_v52, %v147_v40  ;;  %v1058_v2 = vadd.f32 %v959_v35, %v180_v58  ;;  %v295_v25 = vpack.c.bf16 %v239_v16, %v239_v16  ;;  %v369_v32 = vunpack.c.l.b16 %v293_v23 }
  0x45   :  { %v192_v0 = vmax.f32 %v184_v55, 0.0  ;;  %v196_v7 = vmax.f32 %v1052_v42, 0.0  ;;  %v299_v29 = vpack.c.bf16 %v255_v20, %v255_v20  ;;  %v401_v41 = vrot.slane %v367_v31, 7  ;;  %v823_v20 = vld [vmem:[#allocation4 + $0xf0] ss:$8 sps:$4 sm:$0xff]  }
  0x46   :  { %v1063_v5 = vadd.f32 %v959_v35, %v181_v62  ;;  %v198_v11 = vmax.f32 %v1058_v2, 0.0  ;;  %v812_v35 = vld [vmem:[#allocation4 + $0xc4] ss:$8 sps:$4 sm:$0xff]   ;;  %v371_v37 = vunpack.c.l.b16 %v295_v25  ;;  %v403_v43 = vrot.slane %v369_v32, 6 }
  0x47   :  { %598 = vmatpush1.bf16.msra.mxu0 %v805_v19  ;;  %v215_v8 = vrot.slane %v192_v0, %v925_v15  ;;  %v247_v17 = vrot.slane %v196_v7, %v925_v15  ;;  %v211_v38 = vrot.slane %v192_v0, %v930_v18  ;;  %v375_v39 = vunpack.c.l.b16 %v299_v29 }
  0x48   :  { %599 = vmatprep.subr.bf16.mxu0 %v806_v26  ;;  %v199_v14 = vmax.f32 %v1063_v5, 0.0  ;;  %v263_v21 = vrot.slane %v198_v11, %v925_v15  ;;  %v405_v45 = vrot.slane %v371_v37, 5  ;;  %v227_v52 = vrot.slane %v194_v4, %v930_v18 }
  0x49   :  { %v289_v19 = vpack.c.bf16 %v215_v8, %v215_v8  ;;  %v297_v26 = vpack.c.bf16 %v247_v17, %v247_v17  ;;  %v409_v50 = vrot.slane %v375_v39, 3  ;;  %v243_v57 = vrot.slane %v196_v7, %v930_v18  ;;  %v336_v39 = vld [vmem:[%s1119_s2] sm:$0x3] }
  0x4a   :  { %v271_v24 = vrot.slane %v199_v14, %v925_v15  ;;  %v301_v30 = vpack.c.bf16 %v263_v21, %v263_v21  ;;  %v251_v59 = vrot.slane %v197_v10, %v930_v18  ;;  %v259_v60 = vrot.slane %v198_v11, %v930_v18 }
  0x4b   :  { %600 = vmatpush1.bf16.msra.mxu0 %v808_v56  ;;  %v365_v27 = vunpack.c.l.b16 %v289_v19  ;;  %v373_v34 = vunpack.c.l.b16 %v297_v26  ;;  %v235_v56 = vrot.slane %v195_v6, %v930_v18  ;;  %v288_v63 = vpack.c.bf16 %v211_v38, %v211_v38  ;;  %v821_v6 = vld [vmem:[#allocation4 + $0xf4] ss:$8 sps:$4 sm:$0xff]   ;;  %v623_v38 = vld [vmem:[%s1120_s3 + $0x8] sm:$0xff] }
  0x4c   :  { %601 = vmatprep.subr.bf16.mxu0 %v809_v61  ;;  %v303_v36 = vpack.c.bf16 %v271_v24, %v271_v24  ;;  %v377_v40 = vunpack.c.l.b16 %v301_v30  ;;  %v267_v61 = vrot.slane %v199_v14, %v930_v18  ;;  %v290_v42 = vpack.c.bf16 %v219_v47, %v219_v47  ;;  %688 = vmatprep.mubr.f32.mxu1 %v623_v38 }
  0x4d   :  { %v407_v46 = vrot.slane %v373_v34, 4  ;;  %v402_v49 = vsel %vm381_vm0, %v401_v41, %v365_v27  ;;  %v292_v0 = vpack.c.bf16 %v227_v52, %v227_v52  ;;  %v294_v3 = vpack.c.bf16 %v235_v56, %v235_v56 }
  0x4e   :  { %v379_v44 = vunpack.c.l.b16 %v303_v36  ;;  %v411_v51 = vrot.slane %v377_v40, 2  ;;  %v404_v54 = vsel %vm384_vm1, %v403_v43, %v402_v49  ;;  %v296_v4 = vpack.c.bf16 %v243_v57, %v243_v57 }
  0x4f   :  { %602 = vmatpush1.bf16.msra.mxu0 %v811_v9  ;;  %v406_v58 = vsel %vm387_vm2, %v405_v45, %v404_v54  ;;  %v298_v5 = vpack.c.bf16 %v251_v59, %v251_v59  ;;  %v300_v8 = vpack.c.bf16 %v259_v60, %v259_v60  ;;  %v302_v9 = vpack.c.bf16 %v267_v61, %v267_v61 }
  0x50   :  { %603 = vmatprep.subr.bf16.mxu0 %v812_v35  ;;  %v413_v55 = vrot.slane %v379_v44, 1  ;;  %v408_v62 = vsel %vm390_vm3, %v407_v46, %v406_v58  ;;  %v364_v10 = vunpack.c.l.b16 %v288_v63  ;;  %v366_v12 = vunpack.c.l.b16 %v290_v42 }
  0x51   :  { %v410_v2 = vsel %vm393_vm4, %v409_v50, %v408_v62  ;;  %v368_v13 = vunpack.c.l.b16 %v292_v0  ;;  %v370_v35 = vunpack.c.l.b16 %v294_v3  ;;  %v372_v16 = vunpack.c.l.b16 %v296_v4 }
  0x52   :  { %v412_v7 = vsel %vm396_vm5, %v411_v51, %v410_v2  ;;  %v374_v17 = vunpack.c.l.b16 %v298_v5  ;;  %v376_v19 = vunpack.c.l.b16 %v300_v8  ;;  %v378_v21 = vunpack.c.l.b16 %v302_v9  ;;  %v622_v51 = vld [vmem:[%s1120_s3] sm:$0xff] }
  0x53   :  { %604 = vmatpush1.bf16.msra.mxu0 %v814_v28  ;;  %v414_v11 = vsel %vm399_vm6, %v413_v55, %v412_v7  ;;  %v380_v22 = vrot.slane %v366_v12, 7  ;;  %v383_v23 = vrot.slane %v368_v13, 6  ;;  %v386_v24 = vrot.slane %v370_v35, 5 }
  0x54   :  { %605 = vmatprep.subr.bf16.mxu0 %v815_v33  ;;  %v416_v14 = vpack.c.b16 %v414_v11, %v414_v11  ;;  %v389_v25 = vrot.slane %v372_v16, 4  ;;  %v392_v27 = vrot.slane %v374_v17, 3  ;;  %v395_v29 = vrot.slane %v376_v19, 2 }
  0x55   :  { %v382_v26 = vsel %vm381_vm0, %v380_v22, %v364_v10  ;;  %v398_v31 = vrot.slane %v378_v21, 1  ;;  %v341_v40 = vrot.slane %v336_v39, %v930_v18  ;;  %v345_v41 = vrot.slane %v336_v39, %v925_v15 }
  0x56   :  { %611 = vmatprep.mubr.bf16.mxu0 %v416_v14  ;;  %v385_v28 = vsel %vm384_vm1, %v383_v23, %v382_v26  ;;  %v695_v18 = vstv %s1123_s6 }
  0x57   :  { %606 = vmatpush1.bf16.msra.mxu0 %v817_v48  ;;  %v388_v30 = vsel %vm387_vm2, %v386_v24, %v385_v28 }
  0x58   :  { %607 = vmatprep.subr.bf16.mxu0 %v818_v53  ;;  %v391_v32 = vsel %vm390_vm3, %v389_v25, %v388_v30 }
  0x59   :  { %v394_v33 = vsel %vm393_vm4, %v392_v27, %v391_v32 }
  0x5a   :  { %v397_v36 = vsel %vm396_vm5, %v395_v29, %v394_v33 }
  0x5b   :  { %608 = vmatpush1.bf16.msra.mxu0 %v820_v1  ;;  %v400_v37 = vsel %vm399_vm6, %v398_v31, %v397_v36 }
  0x5c   :  { %609 = vmatprep.subr.bf16.mxu0 %v821_v6  ;;  %v415_v34 = vpack.c.b16 %v400_v37, %v400_v37 }
  0x5f   :  { %610 = vmatpush1.bf16.msra.mxu0 %v823_v20 }
  0x62   :  { %612 = vmatmul.mubr.bf16.vlgmr.msra.gmra.mrb[0].mxu0 %v415_v34 }
 0x135   :  { %v613_v43 = vpop.f32.mrb[0].mxu0 }
 0x136   :  { %v614_v44 = vadd.f32 %v613_v43, %v341_v40  ;;  %v615_v45 = vpop.f32.mrb[1].mxu0 }
 0x137   :  { %v617_v46 = vpop.f32.mrb[2].mxu0  ;;  %v616_v47 = vadd.f32 %v615_v45, %v345_v41 }
 0x138   :  { %v618_v48 = vpop.f32.mrb[3].mxu0  ;;  %v620_v50 = vmax.f32 %v614_v44, 0.0 }
 0x139   :  { %v621_v49 = vmax.f32 %v616_v47, 0.0 }
 0x13b   :  { %624 = vmatprep.subr.mxu1 %v621_v49 }
 0x13c   :  { %625 = vmatpush1.xpose.msra.mxu1 %v620_v50 }
 0x13f   :  { %689 = vmatmul.mubr.f32.vlgmr.msra.gmra.mrb[0].mxu1 %v622_v51 }
 0x212   :  { %v690_v15 = vpop.f32.mrb[0].mxu1 }
 0x213   :  { %v696_v52 = vadd.f32 %v695_v18, %v690_v15  ;;  %v692_v53 = vpop.f32.mrb[1].mxu1 }
 0x215   :  { %824 = vtanh.f32 %v696_v52 }
 0x21f   :  { %v825_v54 = vpop.eup %824 }
 0x220   :  { %699 = vst.msk [vmem:[%s1124_s7] sm:$0x1] %vm698_vm7, %v825_v54 }
 0x221   :  { %704 = vsyncpa [#allocation5], 1 }
 0x222   :  { %705 = vsyncpa [#allocation6], 1 }

</bundles_post_ra>
